<compile_context>
chip_gen: v7x
topology: tpu7x:2x2x1
jax: 0.10.0
libtpu: 0.0.40
codegen_flags: <defaults>
</compile_context>

<pallas_src>
import functools

import jax
import jax.numpy as jnp
from jax.experimental import pallas as pl
from jax.experimental.pallas import tpu as pltpu

OUTPUT_PADDING = 1   # NodeDeConv hard-codes output_padding=1 and padding=0.
NEG_SLOPE = 0.1      # nn.LeakyReLU(0.1) — matches the module spec.


# ---------------------------------------------------------------------------
# Fused kernel: one grid step pushes B batch elements through ALL layers.
# ---------------------------------------------------------------------------
def _fused_node_deconv_kernel(*refs, n_layers, apply_act, compute_dtype):
    # refs layout:
    #   refs[0]                x    (1, Cin0, B*Lin0)                compute_dtype
    #   refs[1+3i .. 3+3i]     layer i:
    #       w   (K, Cout, Cin)                                       compute_dtype
    #       s   (K, B*Lin, B*Lout)  0/1 scatter, block-diag over B   compute_dtype
    #       bss (Cout, 3)  [conv bias | BN scale | BN shift]         f32
    #   refs[1+3*n_layers]     out  (1, Cout_last, B*Lout_last)
    x_ref = refs[0]
    o_ref = refs[1 + 3 * n_layers]

    act = x_ref[0]                                       # (Cin0, B*Lin0)
    for li in range(n_layers):
        w_ref = refs[1 + 3 * li]
        s_ref = refs[2 + 3 * li]
        bss_ref = refs[3 + 3 * li]
        K, cout, _ = w_ref.shape
        b_lout = s_ref.shape[2]

        acc = jnp.zeros((cout, b_lout), jnp.float32)
        for k in range(K):                               # K tiny -> static unroll
            # conv tap k: (Cout, Cin) @ (Cin, B*Lin), f32 accumulation.
            ck = jnp.dot(w_ref[k], act, preferred_element_type=jnp.float32)
            # exact col2im scatter-add as a 0/1 matmul:
            # S_k[b*Lin+i, b'*Lout+j] = (b==b') & (j == i*stride + k).
            acc = acc + jnp.dot(ck.astype(compute_dtype), s_ref[k],
                                preferred_element_type=jnp.float32)

        y = acc + bss_ref[:, 0:1]                        # conv bias
        if apply_act[li]:
            y = jnp.where(y > 0, y, NEG_SLOPE * y)       # LeakyReLU(0.1)
            # Dropout = identity at inference; eval-mode BatchNorm1d folded
            # into (scale, shift) by the wrapper.
            y = y * bss_ref[:, 1:2] + bss_ref[:, 2:3]
        act = y.astype(compute_dtype) if li + 1 < n_layers else y

    o_ref[0] = act.astype(o_ref.dtype)


def node_deconv_forward(x, params, stride, *, batch_block=4,
                        compute_dtype=jnp.bfloat16, eps=1e-5):
    """Fused NodeDeConv forward (inference). x: (N, Cin0, Lin0) -> (N, Cout, Lout)."""
    N, cin0, lin0 = x.shape
    n_layers = len(params)
    B = int(batch_block)
    G = (N + B - 1) // B
    n_pad = G * B

    if n_pad != N:                                       # pad batch to a multiple of B
        x = jnp.pad(x, ((0, n_pad - N), (0, 0), (0, 0)))
    # (N, C, L) -> (G, C, B*L): batch folded into the lane dimension.
    x_r = (x.reshape(G, B, cin0, lin0).transpose(0, 2, 1, 3)
             .reshape(G, cin0, B * lin0).astype(compute_dtype))

    operands = [x_r]
    in_specs = [pl.BlockSpec((1, cin0, B * lin0), lambda g: (g, 0, 0))]
    apply_act = []

    L = lin0
    cout = cin0
    for i, p in enumerate(params):
        w, b = p["w"], p["b"]
        cin, cout, K = w.shape
        s = int(stride[i])
        lout = (L - 1) * s + K + OUTPUT_PADDING
        is_last = i == n_layers - 1

        # ConvTranspose1d weight (Cin, Cout, K) -> (K, Cout, Cin).
        wt = jnp.transpose(w, (2, 1, 0)).astype(compute_dtype)

        # 0/1 scatter matrices, block-diagonal over the batch block.
        k_idx = jnp.arange(K)[:, None, None, None, None]
        b_idx = jnp.arange(B)[None, :, None, None, None]
        i_idx = jnp.arange(L)[None, None, :, None, None]
        bp_idx = jnp.arange(B)[None, None, None, :, None]
        j_idx = jnp.arange(lout)[None, None, None, None, :]
        smat = ((b_idx == bp_idx) & (j_idx == i_idx * s + k_idx))
        smat = smat.reshape(K, B * L, B * lout).astype(compute_dtype)

        if is_last:                                      # last layer: plain ConvT
            scale = jnp.ones((cout,), jnp.float32)
            shift = jnp.zeros((cout,), jnp.float32)
        else:                                            # fold eval-mode BN
            scale = p["gamma"] * jax.lax.rsqrt(p["running_var"] + eps)
            shift = p["beta"] - p["running_mean"] * scale
        bss = jnp.stack([b.astype(jnp.float32), scale, shift], axis=1)   # (Cout, 3)

        operands += [wt, smat, bss]
        in_specs += [
            pl.BlockSpec((K, cout, cin), lambda g: (0, 0, 0)),
            pl.BlockSpec((K, B * L, B * lout), lambda g: (0, 0, 0)),
            pl.BlockSpec((cout, 3), lambda g: (0, 0)),
        ]
        apply_act.append(not is_last)
        L = lout

    kern = functools.partial(
        _fused_node_deconv_kernel, n_layers=n_layers,
        apply_act=tuple(apply_act), compute_dtype=compute_dtype)

    out_r = pl.pallas_call(
        kern,
        out_shape=jax.ShapeDtypeStruct((G, cout, B * L), jnp.float32),
        grid_spec=pltpu.PrefetchScalarGridSpec(
            num_scalar_prefetch=0,
            grid=(G,),
            in_specs=in_specs,
            out_specs=pl.BlockSpec((1, cout, B * L), lambda g: (g, 0, 0)),
        ),
        compiler_params=pltpu.CompilerParams(
            dimension_semantics=("parallel",),   # batch blocks split across TCs (v7x)
        ),
    )(*operands)

    # (G, C, B*L) -> (N, C, L); wrapper-side layout plumbing only.
    out = (out_r.reshape(G, cout, B, L).transpose(0, 2, 1, 3)
                 .reshape(n_pad, cout, L))
    return out[:N]


# ---------------------------------------------------------------------------
# Deterministic parameter init + pure-JAX (f32) reference
# ---------------------------------------------------------------------------
def init_params(channel_seq, kernel_size, key):
    params = []
    for i in range(1, len(channel_seq)):
        cin, cout = channel_seq[i - 1], channel_seq[i]
        key, k1, k2 = jax.random.split(key, 3)
        bound = 1.0 / float(cin * kernel_size) ** 0.5
        w = jax.random.uniform(k1, (cin, cout, kernel_size), jnp.float32, -bound, bound)
        b = jax.random.uniform(k2, (cout,), jnp.float32, -bound, bound)
        params.append(dict(
            w=w, b=b,
            gamma=1.0 + 0.1 * jnp.arange(cout, dtype=jnp.float32),
            beta=0.05 * jnp.arange(cout, dtype=jnp.float32),
            running_mean=0.01 * jnp.arange(cout, dtype=jnp.float32),
            running_var=1.0 + 0.02 * jnp.arange(cout, dtype=jnp.float32),
        ))
    return params


def ref_forward(x, params, stride, eps=1e-5):
    n = len(params)
    for i, p in enumerate(params):
        w, b = p["w"], p["b"]
        N, Cin, Lin = x.shape
        _, Cout, K = w.shape
        s = stride[i]
        Lout = (Lin - 1) * s + K + OUTPUT_PADDING
        y = jnp.zeros((N, Cout, Lout), jnp.float32)
        for k in range(K):
            c = jnp.einsum("nci,co->noi", x, w[:, :, k])
            y = y.at[:, :, k:k + (Lin - 1) * s + 1:s].add(c)
        y = y + b.reshape(1, Cout, 1)
        if i < n - 1:
            y = jnp.where(y > 0, y, NEG_SLOPE * y)
            y = ((y - p["running_mean"].reshape(1, -1, 1))
                 / jnp.sqrt(p["running_var"].reshape(1, -1, 1) + eps)
                 * p["gamma"].reshape(1, -1, 1) + p["beta"].reshape(1, -1, 1))
        x = y
    return x


# ---------------------------------------------------------------------------
if __name__ == "__main__":
    channel_seq = [4, 8, 3]   # 2 layers: [ConvT+LeakyReLU+Dropout+BN], [ConvT]
    kernel_size = 3
    stride = (2, 2)
    N, Lin = 8, 8             # batch blocked 4-per-grid-step -> grid=(2,)

    key = jax.random.PRNGKey(0)
    key, kx = jax.random.split(key)
    x = jax.random.normal(kx, (N, channel_seq[0], Lin), jnp.float32)
    params = init_params(channel_seq, kernel_size, key)

    fwd = jax.jit(node_deconv_forward,
                  static_argnames=("stride", "batch_block", "compute_dtype"))
    ref = ref_forward(x, params, stride)

    # Exact path (f32 operands end-to-end) vs the pure-JAX reference.
    out_f32 = jax.block_until_ready(
        fwd(x, params, stride=stride, batch_block=4, compute_dtype=jnp.float32))
    assert out_f32.shape == ref.shape, (out_f32.shape, ref.shape)
    assert jnp.allclose(out_f32, ref, atol=5e-4, rtol=5e-4), \
        float(jnp.abs(out_f32 - ref).max())

    # Batch block that does not divide N (exercises the pad/slice path).
    out_pad = jax.block_until_ready(
        fwd(x, params, stride=stride, batch_block=3, compute_dtype=jnp.float32))
    assert jnp.allclose(out_pad, ref, atol=5e-4, rtol=5e-4), \
        float(jnp.abs(out_pad - ref).max())

    # Fast path (bf16 operands, f32 accumulation): loose sanity bound — only
    # bf16 rounding of matmul operands differs from the f32 reference.
    out_bf16 = jax.block_until_ready(
        fwd(x, params, stride=stride, batch_block=4, compute_dtype=jnp.bfloat16))
    bf16_err = float(jnp.abs(out_bf16.astype(jnp.float32) - ref).max())
    assert out_bf16.shape == ref.shape, (out_bf16.shape, ref.shape)
    assert bf16_err < 0.15, bf16_err

    print("KERNEL_OK")
</pallas_src>

<mosaic_0001>
module attributes {stable_mosaic.version = 11 : i64} {
  func.func @_fused_node_deconv_kernel(%arg0: i32, %arg1: memref<1x4x32xf32, #tpu.memory_space<vmem>>, %arg2: memref<3x8x4xf32, #tpu.memory_space<vmem>>, %arg3: memref<3x32x72xf32, #tpu.memory_space<vmem>>, %arg4: memref<8x3xf32, #tpu.memory_space<vmem>>, %arg5: memref<3x3x8xf32, #tpu.memory_space<vmem>>, %arg6: memref<3x72x152xf32, #tpu.memory_space<vmem>>, %arg7: memref<3x3xf32, #tpu.memory_space<vmem>>, %arg8: memref<1x3x152xf32, #tpu.memory_space<vmem>>) attributes {dimension_semantics = [#tpu.dimension_semantics<parallel>], iteration_bounds = array<i64: 2>, scalar_prefetch = 0 : i64, scratch_operands = 0 : i64, tpu.core_type = #tpu.core_type<tc>, window_params = [{transform_indices = @transform_0, window_bounds = array<i64: 1, 4, 32>}, {pipeline_mode = #tpu.pipeline_mode<synchronous>, transform_indices = @transform_1, window_bounds = array<i64: 3, 8, 4>}, {pipeline_mode = #tpu.pipeline_mode<synchronous>, transform_indices = @transform_2, window_bounds = array<i64: 3, 32, 72>}, {pipeline_mode = #tpu.pipeline_mode<synchronous>, transform_indices = @transform_3, window_bounds = array<i64: 8, 3>}, {pipeline_mode = #tpu.pipeline_mode<synchronous>, transform_indices = @transform_4, window_bounds = array<i64: 3, 3, 8>}, {pipeline_mode = #tpu.pipeline_mode<synchronous>, transform_indices = @transform_5, window_bounds = array<i64: 3, 72, 152>}, {pipeline_mode = #tpu.pipeline_mode<synchronous>, transform_indices = @transform_6, window_bounds = array<i64: 3, 3>}, {transform_indices = @transform_7, window_bounds = array<i64: 1, 3, 152>}]} {
    %c0 = arith.constant 0 : index
    %c0_0 = arith.constant 0 : index
    %c0_1 = arith.constant 0 : index
    %0 = vector.load %arg1[%c0, %c0_0, %c0_1] : memref<1x4x32xf32, #tpu.memory_space<vmem>>, vector<1x4x32xf32>
    %1 = vector.shape_cast %0 : vector<1x4x32xf32> to vector<4x32xf32>
    %cst = arith.constant 0.000000e+00 : f32
    %2 = vector.broadcast %cst : f32 to vector<8x72xf32>
    %c0_2 = arith.constant 0 : index
    %c0_3 = arith.constant 0 : index
    %c0_4 = arith.constant 0 : index
    %3 = vector.load %arg2[%c0_2, %c0_3, %c0_4] : memref<3x8x4xf32, #tpu.memory_space<vmem>>, vector<1x8x4xf32>
    %4 = vector.shape_cast %3 : vector<1x8x4xf32> to vector<8x4xf32>
    %cst_5 = arith.constant dense<0.000000e+00> : vector<8x32xf32>
    %5 = tpu.matmul %4, %1, %cst_5 {dimension_numbers = #tpu.dot_dimension_numbers<[1], [0], [0], [1], [0, 0, 1, 1], [], []>} : vector<8x4xf32>, vector<4x32xf32>, vector<8x32xf32> -> vector<8x32xf32>
    %c0_6 = arith.constant 0 : index
    %c0_7 = arith.constant 0 : index
    %c0_8 = arith.constant 0 : index
    %6 = vector.load %arg3[%c0_6, %c0_7, %c0_8] : memref<3x32x72xf32, #tpu.memory_space<vmem>>, vector<1x32x72xf32>
    %7 = vector.shape_cast %6 : vector<1x32x72xf32> to vector<32x72xf32>
    %cst_9 = arith.constant dense<0.000000e+00> : vector<8x72xf32>
    %8 = tpu.matmul %5, %7, %cst_9 {dimension_numbers = #tpu.dot_dimension_numbers<[1], [0], [0], [1], [0, 0, 1, 1], [], []>} : vector<8x32xf32>, vector<32x72xf32>, vector<8x72xf32> -> vector<8x72xf32>
    %9 = arith.addf %2, %8 : vector<8x72xf32>
    %c1 = arith.constant 1 : index
    %c0_10 = arith.constant 0 : index
    %c0_11 = arith.constant 0 : index
    %10 = vector.load %arg2[%c1, %c0_10, %c0_11] : memref<3x8x4xf32, #tpu.memory_space<vmem>>, vector<1x8x4xf32>
    %11 = vector.shape_cast %10 : vector<1x8x4xf32> to vector<8x4xf32>
    %cst_12 = arith.constant dense<0.000000e+00> : vector<8x32xf32>
    %12 = tpu.matmul %11, %1, %cst_12 {dimension_numbers = #tpu.dot_dimension_numbers<[1], [0], [0], [1], [0, 0, 1, 1], [], []>} : vector<8x4xf32>, vector<4x32xf32>, vector<8x32xf32> -> vector<8x32xf32>
    %c1_13 = arith.constant 1 : index
    %c0_14 = arith.constant 0 : index
    %c0_15 = arith.constant 0 : index
    %13 = vector.load %arg3[%c1_13, %c0_14, %c0_15] : memref<3x32x72xf32, #tpu.memory_space<vmem>>, vector<1x32x72xf32>
    %14 = vector.shape_cast %13 : vector<1x32x72xf32> to vector<32x72xf32>
    %cst_16 = arith.constant dense<0.000000e+00> : vector<8x72xf32>
    %15 = tpu.matmul %12, %14, %cst_16 {dimension_numbers = #tpu.dot_dimension_numbers<[1], [0], [0], [1], [0, 0, 1, 1], [], []>} : vector<8x32xf32>, vector<32x72xf32>, vector<8x72xf32> -> vector<8x72xf32>
    %16 = arith.addf %9, %15 : vector<8x72xf32>
    %c2 = arith.constant 2 : index
    %c0_17 = arith.constant 0 : index
    %c0_18 = arith.constant 0 : index
    %17 = vector.load %arg2[%c2, %c0_17, %c0_18] : memref<3x8x4xf32, #tpu.memory_space<vmem>>, vector<1x8x4xf32>
    %18 = vector.shape_cast %17 : vector<1x8x4xf32> to vector<8x4xf32>
    %cst_19 = arith.constant dense<0.000000e+00> : vector<8x32xf32>
    %19 = tpu.matmul %18, %1, %cst_19 {dimension_numbers = #tpu.dot_dimension_numbers<[1], [0], [0], [1], [0, 0, 1, 1], [], []>} : vector<8x4xf32>, vector<4x32xf32>, vector<8x32xf32> -> vector<8x32xf32>
    %c2_20 = arith.constant 2 : index
    %c0_21 = arith.constant 0 : index
    %c0_22 = arith.constant 0 : index
    %20 = vector.load %arg3[%c2_20, %c0_21, %c0_22] : memref<3x32x72xf32, #tpu.memory_space<vmem>>, vector<1x32x72xf32>
    %21 = vector.shape_cast %20 : vector<1x32x72xf32> to vector<32x72xf32>
    %cst_23 = arith.constant dense<0.000000e+00> : vector<8x72xf32>
    %22 = tpu.matmul %19, %21, %cst_23 {dimension_numbers = #tpu.dot_dimension_numbers<[1], [0], [0], [1], [0, 0, 1, 1], [], []>} : vector<8x32xf32>, vector<32x72xf32>, vector<8x72xf32> -> vector<8x72xf32>
    %23 = arith.addf %16, %22 : vector<8x72xf32>
    %c0_24 = arith.constant 0 : index
    %c0_25 = arith.constant 0 : index
    %24 = vector.load %arg4[%c0_24, %c0_25] : memref<8x3xf32, #tpu.memory_space<vmem>>, vector<8x1xf32>
    %25 = vector.broadcast %24 : vector<8x1xf32> to vector<8x72xf32>
    %26 = arith.addf %23, %25 : vector<8x72xf32>
    %cst_26 = arith.constant 0.000000e+00 : f32
    %27 = vector.broadcast %cst_26 : f32 to vector<8x72xf32>
    %28 = arith.cmpf ogt, %26, %27 : vector<8x72xf32>
    %cst_27 = arith.constant 1.000000e-01 : f32
    %29 = vector.broadcast %cst_27 : f32 to vector<8x72xf32>
    %30 = arith.mulf %29, %26 : vector<8x72xf32>
    %31 = arith.select %28, %26, %30 : vector<8x72xi1>, vector<8x72xf32>
    %c0_28 = arith.constant 0 : index
    %c1_29 = arith.constant 1 : index
    %32 = vector.load %arg4[%c0_28, %c1_29] : memref<8x3xf32, #tpu.memory_space<vmem>>, vector<8x1xf32>
    %33 = vector.broadcast %32 : vector<8x1xf32> to vector<8x72xf32>
    %34 = arith.mulf %31, %33 : vector<8x72xf32>
    %c0_30 = arith.constant 0 : index
    %c2_31 = arith.constant 2 : index
    %35 = vector.load %arg4[%c0_30, %c2_31] : memref<8x3xf32, #tpu.memory_space<vmem>>, vector<8x1xf32>
    %36 = vector.broadcast %35 : vector<8x1xf32> to vector<8x72xf32>
    %37 = arith.addf %34, %36 : vector<8x72xf32>
    %cst_32 = arith.constant 0.000000e+00 : f32
    %38 = vector.broadcast %cst_32 : f32 to vector<3x152xf32>
    %c0_33 = arith.constant 0 : index
    %c0_34 = arith.constant 0 : index
    %c0_35 = arith.constant 0 : index
    %39 = vector.load %arg5[%c0_33, %c0_34, %c0_35] : memref<3x3x8xf32, #tpu.memory_space<vmem>>, vector<1x3x8xf32>
    %40 = vector.shape_cast %39 : vector<1x3x8xf32> to vector<3x8xf32>
    %cst_36 = arith.constant dense<0.000000e+00> : vector<3x72xf32>
    %41 = tpu.matmul %40, %37, %cst_36 {dimension_numbers = #tpu.dot_dimension_numbers<[1], [0], [0], [1], [0, 0, 1, 1], [], []>} : vector<3x8xf32>, vector<8x72xf32>, vector<3x72xf32> -> vector<3x72xf32>
    %c0_37 = arith.constant 0 : index
    %c0_38 = arith.constant 0 : index
    %c0_39 = arith.constant 0 : index
    %42 = vector.load %arg6[%c0_37, %c0_38, %c0_39] : memref<3x72x152xf32, #tpu.memory_space<vmem>>, vector<1x72x152xf32>
    %43 = vector.shape_cast %42 : vector<1x72x152xf32> to vector<72x152xf32>
    %cst_40 = arith.constant dense<0.000000e+00> : vector<3x152xf32>
    %44 = tpu.matmul %41, %43, %cst_40 {dimension_numbers = #tpu.dot_dimension_numbers<[1], [0], [0], [1], [0, 0, 1, 1], [], []>} : vector<3x72xf32>, vector<72x152xf32>, vector<3x152xf32> -> vector<3x152xf32>
    %45 = arith.addf %38, %44 : vector<3x152xf32>
    %c1_41 = arith.constant 1 : index
    %c0_42 = arith.constant 0 : index
    %c0_43 = arith.constant 0 : index
    %46 = vector.load %arg5[%c1_41, %c0_42, %c0_43] : memref<3x3x8xf32, #tpu.memory_space<vmem>>, vector<1x3x8xf32>
    %47 = vector.shape_cast %46 : vector<1x3x8xf32> to vector<3x8xf32>
    %cst_44 = arith.constant dense<0.000000e+00> : vector<3x72xf32>
    %48 = tpu.matmul %47, %37, %cst_44 {dimension_numbers = #tpu.dot_dimension_numbers<[1], [0], [0], [1], [0, 0, 1, 1], [], []>} : vector<3x8xf32>, vector<8x72xf32>, vector<3x72xf32> -> vector<3x72xf32>
    %c1_45 = arith.constant 1 : index
    %c0_46 = arith.constant 0 : index
    %c0_47 = arith.constant 0 : index
    %49 = vector.load %arg6[%c1_45, %c0_46, %c0_47] : memref<3x72x152xf32, #tpu.memory_space<vmem>>, vector<1x72x152xf32>
    %50 = vector.shape_cast %49 : vector<1x72x152xf32> to vector<72x152xf32>
    %cst_48 = arith.constant dense<0.000000e+00> : vector<3x152xf32>
    %51 = tpu.matmul %48, %50, %cst_48 {dimension_numbers = #tpu.dot_dimension_numbers<[1], [0], [0], [1], [0, 0, 1, 1], [], []>} : vector<3x72xf32>, vector<72x152xf32>, vector<3x152xf32> -> vector<3x152xf32>
    %52 = arith.addf %45, %51 : vector<3x152xf32>
    %c2_49 = arith.constant 2 : index
    %c0_50 = arith.constant 0 : index
    %c0_51 = arith.constant 0 : index
    %53 = vector.load %arg5[%c2_49, %c0_50, %c0_51] : memref<3x3x8xf32, #tpu.memory_space<vmem>>, vector<1x3x8xf32>
    %54 = vector.shape_cast %53 : vector<1x3x8xf32> to vector<3x8xf32>
    %cst_52 = arith.constant dense<0.000000e+00> : vector<3x72xf32>
    %55 = tpu.matmul %54, %37, %cst_52 {dimension_numbers = #tpu.dot_dimension_numbers<[1], [0], [0], [1], [0, 0, 1, 1], [], []>} : vector<3x8xf32>, vector<8x72xf32>, vector<3x72xf32> -> vector<3x72xf32>
    %c2_53 = arith.constant 2 : index
    %c0_54 = arith.constant 0 : index
    %c0_55 = arith.constant 0 : index
    %56 = vector.load %arg6[%c2_53, %c0_54, %c0_55] : memref<3x72x152xf32, #tpu.memory_space<vmem>>, vector<1x72x152xf32>
    %57 = vector.shape_cast %56 : vector<1x72x152xf32> to vector<72x152xf32>
    %cst_56 = arith.constant dense<0.000000e+00> : vector<3x152xf32>
    %58 = tpu.matmul %55, %57, %cst_56 {dimension_numbers = #tpu.dot_dimension_numbers<[1], [0], [0], [1], [0, 0, 1, 1], [], []>} : vector<3x72xf32>, vector<72x152xf32>, vector<3x152xf32> -> vector<3x152xf32>
    %59 = arith.addf %52, %58 : vector<3x152xf32>
    %c0_57 = arith.constant 0 : index
    %c0_58 = arith.constant 0 : index
    %60 = vector.load %arg7[%c0_57, %c0_58] : memref<3x3xf32, #tpu.memory_space<vmem>>, vector<3x1xf32>
    %61 = vector.broadcast %60 : vector<3x1xf32> to vector<3x152xf32>
    %62 = arith.addf %59, %61 : vector<3x152xf32>
    %c0_59 = arith.constant 0 : index
    %c0_60 = arith.constant 0 : index
    %c0_61 = arith.constant 0 : index
    %63 = vector.load %arg8[%c0_59, %c0_60, %c0_61] : memref<1x3x152xf32, #tpu.memory_space<vmem>>, vector<1x3x152xf32>
    %64 = vector.shape_cast %63 : vector<1x3x152xf32> to vector<3x152xf32>
    %65 = vector.shape_cast %62 : vector<3x152xf32> to vector<1x3x152xf32>
    tpu.vector_store %arg8[%c0_59, %c0_60, %c0_61], %65 {strides = array<i32>} : memref<1x3x152xf32, #tpu.memory_space<vmem>>, vector<1x3x152xf32>,
    return
  }
  func.func @transform_0(%arg0: i32) -> (i32, i32, i32) {
    %c0_i32 = arith.constant 0 : i32
    %c0_i32_0 = arith.constant 0 : i32
    %c0_i32_1 = arith.constant 0 : i32
    return %arg0, %c0_i32, %c0_i32_0 : i32, i32, i32
  }
  func.func @transform_1(%arg0: i32) -> (i32, i32, i32) {
    %c0_i32 = arith.constant 0 : i32
    %c0_i32_0 = arith.constant 0 : i32
    %c0_i32_1 = arith.constant 0 : i32
    %c0_i32_2 = arith.constant 0 : i32
    return %c0_i32, %c0_i32_0, %c0_i32_1 : i32, i32, i32
  }
  func.func @transform_2(%arg0: i32) -> (i32, i32, i32) {
    %c0_i32 = arith.constant 0 : i32
    %c0_i32_0 = arith.constant 0 : i32
    %c0_i32_1 = arith.constant 0 : i32
    %c0_i32_2 = arith.constant 0 : i32
    return %c0_i32, %c0_i32_0, %c0_i32_1 : i32, i32, i32
  }
  func.func @transform_3(%arg0: i32) -> (i32, i32) {
    %c0_i32 = arith.constant 0 : i32
    %c0_i32_0 = arith.constant 0 : i32
    %c0_i32_1 = arith.constant 0 : i32
    return %c0_i32, %c0_i32_0 : i32, i32
  }
  func.func @transform_4(%arg0: i32) -> (i32, i32, i32) {
    %c0_i32 = arith.constant 0 : i32
    %c0_i32_0 = arith.constant 0 : i32
    %c0_i32_1 = arith.constant 0 : i32
    %c0_i32_2 = arith.constant 0 : i32
    return %c0_i32, %c0_i32_0, %c0_i32_1 : i32, i32, i32
  }
  func.func @transform_5(%arg0: i32) -> (i32, i32, i32) {
    %c0_i32 = arith.constant 0 : i32
    %c0_i32_0 = arith.constant 0 : i32
    %c0_i32_1 = arith.constant 0 : i32
    %c0_i32_2 = arith.constant 0 : i32
    return %c0_i32, %c0_i32_0, %c0_i32_1 : i32, i32, i32
  }
  func.func @transform_6(%arg0: i32) -> (i32, i32) {
    %c0_i32 = arith.constant 0 : i32
    %c0_i32_0 = arith.constant 0 : i32
    %c0_i32_1 = arith.constant 0 : i32
    return %c0_i32, %c0_i32_0 : i32, i32
  }
  func.func @transform_7(%arg0: i32) -> (i32, i32, i32) {
    %c0_i32 = arith.constant 0 : i32
    %c0_i32_0 = arith.constant 0 : i32
    %c0_i32_1 = arith.constant 0 : i32
    return %arg0, %c0_i32, %c0_i32_0 : i32, i32, i32
  }
}

</mosaic_0001>

<bundles_post_ra>
// kernel: node_deconv_forward.1
= control target key start
LH: loop header
LB: loop body
LE: loop exit
PB: predicated region body
PF: predicated region fallthrough
CT: control target
= control target key end

     0   :  { %s1645_s24 = smov 0   ;;  %s1935_s0 = inlined_call_operand.vmem [shape: f32[2,4,32], index: 0, kind: input, shape index: {}]   ;;  %s1936_s1 = inlined_call_operand.vmem [shape: f32[3,8,4], index: 1, kind: input, shape index: {}]   ;;  %s1937_s2 = inlined_call_operand.vmem [shape: f32[3,32,72], index: 2, kind: input, shape index: {}]   ;;  %s1938_s3 = inlined_call_operand.vmem [shape: f32[8,3], index: 3, kind: input, shape index: {}]   ;;  %s1939_s4 = inlined_call_operand.vmem [shape: f32[3,3,8], index: 4, kind: input, shape index: {}]   ;;  %s1940_s5 = inlined_call_operand.vmem [shape: f32[3,72,152], index: 5, kind: input, shape index: {}]   ;;  %s1941_s6 = inlined_call_operand.vmem [shape: f32[3,3], index: 6, kind: input, shape index: {}]   ;;  %s1942_s7 = inlined_call_operand.vmem [shape: f32[2,3,152], index: 7, kind: output, shape index: {}]  }
   0x1 LB: > { %s1338_s25 = sadd.s32 4294967295, %s1597_s24   ;;  %p1342_p0 = scmp.ge.s32.totalorder %s1597_s24, 1  ;;  %s1597_s24 = sphi %s1645_s24, %s17_s24  }
   0x2   : > { %p236_p1 = scmp.lt.s32.totalorder %s1597_s24, 3 }
   0x4   : > { %p237_p2 = pnand %p1342_p0, %p236_p1 }
   0x5   : > { %p267_p3 = scmp.lt.s32.totalorder (!%p237_p2), %s1338_s25, 1  ;;  %v1599_v0 = vmov (!%p237_p2), 0.0   ;;  %vm1600_vm0 = vmmov (!%p237_p2), 0   ;;  %v356_v1 = vld [vmem:[%s1937_s2] sm:$0xff] (!%p237_p2)  ;;  %v357_v2 = vld [vmem:[%s1937_s2 + $0x8] sm:$0xff] (!%p237_p2)  ;;  %v1601_v3 = vmov (!%p237_p2), 0.0|0.0  }
   0x6   : > { %240 = sbr.rel (%p237_p2) target bundleno = 1326 (0x52e), region = 48  ;;  %1439 = vmatprep.subr.mxu0 (!%p237_p2), %v1599_v0  ;;  %1441 = vmatprep.mubr.msk.f32.mxu0 (!%p237_p2), %vm1600_vm0, %v1599_v0  ;;  %v1509_v4 = vpack.c.bf16 (!%p237_p2), %v357_v2, %v356_v1  ;;  %v358_v5 = vld [vmem:[%s1937_s2 + $0x10] sm:$0xff] (!%p237_p2)  ;;  %v359_v6 = vld [vmem:[%s1937_s2 + $0x18] sm:$0xff] (!%p237_p2)  ;;  %vm282_vm1 = vcmask (!%p237_p2), 1043456   ;;  %v277_v7 = vld [vmem:[%s1936_s1] sm:$0xff] (!%p237_p2)  ;;  %vm278_vm2 = vcmask (!%p237_p2), 31744  }
   0x7   : > { %1508 = vmatprep.subr.bf16.mxu1 (!%p237_p2), %v1601_v3  ;;  %1468 = vmatprep.mubr.msk.f32.mxu1 (!%p237_p2), %vm1600_vm0, %v1599_v0  ;;  %v1351_v9 = vld [vmem:[%s1937_s2 + $0x20] sm:$0xff] (!%p237_p2)  ;;  %v1352_v10 = vld [vmem:[%s1937_s2 + $0x28] sm:$0xff] (!%p237_p2)  ;;  %v1512_v11 = vpack.c.bf16 (!%p237_p2), %v359_v6, %v358_v5  ;;  %v1353_v14 = vld [vmem:[%s1937_s2 + $0x30] sm:$0xff] (!%p237_p2)  ;;  %vm440_vm3 = vcmask (!%p237_p2), 261120   ;;  %v1602_v29 = vmov (!%p237_p2), 0   ;;  %v1603_v30 = vmov (!%p237_p2), 2  }
   0x8   : > { %1510 = vmatpush3.bf16.msra.mxu1 (!%p237_p2), %v1509_v4  ;;  %v1348_v12 = vld [vmem:[%s1936_s1 + $0x8] sm:$0xff] (!%p237_p2)  ;;  %v1503_v13 = vpack.c.bf16 (!%p237_p2), %v1352_v10, %v1351_v9  ;;  %v1354_v15 = vld [vmem:[%s1937_s2 + $0x38] sm:$0xff] (!%p237_p2)  ;;  %v1357_v21 = vld [vmem:[%s1936_s1 + $0x10] sm:$0xff] (!%p237_p2)  ;;  %1586 = vset.pattern.permute.xlu0 (!%p237_p2), %v1602_v29  ;;  %v1604_v31 = vmov (!%p237_p2), 1   ;;  %vm762_vm5 = vcmask (!%p237_p2), 64512   ;;  %vm948_vm6 = vcmask (!%p237_p2), 588800  }
   0x9   : > { %1511 = vmatprep.subr.bf16.mxu1 (!%p237_p2), %v1601_v3  ;;  %v1506_v16 = vpack.c.bf16 (!%p237_p2), %v1354_v15, %v1353_v14  ;;  %v1360_v22 = vld [vmem:[%s1937_s2 + $0x40] sm:$0xff] (!%p237_p2)  ;;  %v1361_v23 = vld [vmem:[%s1937_s2 + $0x48] sm:$0xff] (!%p237_p2)  ;;  %v1362_v25 = vld [vmem:[%s1937_s2 + $0x50] sm:$0xff] (!%p237_p2)  ;;  %1588 = vset.pattern.permute.xlu1 (!%p237_p2), %v1603_v30  ;;  %vm1279_vm7 = vcmask (!%p237_p2), 1042432   ;;  %vm1280_vm8 = vcmask (!%p237_p2), 194564  }
   0xa   : > { %v1515_v24 = vpack.c.bf16 (!%p237_p2), %v1361_v23, %v1360_v22  ;;  %v1363_v26 = vld [vmem:[%s1937_s2 + $0x58] sm:$0xff] (!%p237_p2)  ;;  %v741_v28 = vld [vmem:[%s1938_s3] sm:$0xff] (!%p237_p2)  ;;  %v837_v39 = vld [vmem:[%s1940_s5 + $0x8] sm:$0xff] (!%p237_p2) }
   0xb   : > { %v1518_v27 = vpack.c.bf16 (!%p237_p2), %v1363_v26, %v1362_v25  ;;  %744 = vperm.xlu0 (!%p237_p2), %1586, %v741_v28   ;;  %757 = vperm.xlu1 (!%p237_p2), %1588, %v741_v28   ;;  %v839_v40 = vld [vmem:[%s1940_s5 + $0x18] sm:$0xff] (!%p237_p2)  ;;  %v836_v42 = vld [vmem:[%s1940_s5] sm:$0xff] (!%p237_p2)  ;;  %v838_v43 = vld [vmem:[%s1940_s5 + $0x10] sm:$0xff] (!%p237_p2) }
   0xc   : > { %1513 = vmatpush3.bf16.msra.mxu1 (!%p237_p2), %v1512_v11  ;;  %v1536_v41 = vpack.c.bf16 (!%p237_p2), %v839_v40, %v837_v39  ;;  %v1538_v44 = vpack.c.bf16 (!%p237_p2), %v838_v43, %v836_v42  ;;  %v841_v45 = vld [vmem:[%s1940_s5 + $0x28] sm:$0xff] (!%p237_p2)  ;;  %v843_v46 = vld [vmem:[%s1940_s5 + $0x38] sm:$0xff] (!%p237_p2)  ;;  %v840_v48 = vld [vmem:[%s1940_s5 + $0x20] sm:$0xff] (!%p237_p2) }
   0xd   : > { %s1944_s25 = smov (!%p267_p3, %s1338_s25), 1  ;;  %1514 = vmatprep.subr.bf16.mxu1 %v1601_v3  ;;  %v1540_v47 = vpack.c.bf16 %v843_v46, %v841_v45  ;;  %v842_v49 = vld [vmem:[%s1940_s5 + $0x30] sm:$0xff]  ;;  %v845_v51 = vld [vmem:[%s1940_s5 + $0x48] sm:$0xff]  ;;  %v847_v52 = vld [vmem:[%s1940_s5 + $0x58] sm:$0xff] }
   0xe   : > { %s1343_s11 = sshll.u32 %s1944_s25, 2  ;;  %v1542_v50 = vpack.c.bf16 %v842_v49, %v840_v48  ;;  %v1544_v53 = vpack.c.bf16 %v847_v52, %v845_v51  ;;  %v844_v54 = vld [vmem:[%s1940_s5 + $0x40] sm:$0xff]  ;;  %v846_v55 = vld [vmem:[%s1940_s5 + $0x50] sm:$0xff]  ;;  %v849_v57 = vld [vmem:[%s1940_s5 + $0x68] sm:$0xff]  ;;  %s1411_s8 = sshll.u32 %s1944_s25, 3 }
   0xf   : > { %s270_s14 = scalar_lea.vmem %s1935_s0, %s1343_s11  ;;  %1587 = vset.pattern.permute.xlu0 %v1604_v31  ;;  %1589 = vset.pattern.permute.xlu1 %v1602_v29  ;;  %v1546_v56 = vpack.c.bf16 %v846_v55, %v844_v54  ;;  %v851_v58 = vld [vmem:[%s1940_s5 + $0x78] sm:$0xff]  ;;  %v848_v60 = vld [vmem:[%s1940_s5 + $0x60] sm:$0xff]  ;;  %v850_v61 = vld [vmem:[%s1940_s5 + $0x70] sm:$0xff]  ;;  %s275_s11 = scalar_lea.vmem %s1942_s7, %s1411_s8 }
  0x10   : > { %v276_v8 = vld [vmem:[%s270_s14] sm:$0xf]  ;;  %752 = vperm.xlu0 %1587, %v741_v28   ;;  %v1548_v59 = vpack.c.bf16 %v851_v58, %v849_v57  ;;  %v1550_v62 = vpack.c.bf16 %v850_v61, %v848_v60  ;;  %v1369_v10 = vld [vmem:[%s1940_s5 + $0x98] sm:$0xff]  ;;  %v1371_v11 = vld [vmem:[%s1940_s5 + $0xa8] sm:$0xff] }
  0x11   : > { %1440 = vmatpush3.msk.msra.mxu0 %vm282_vm1, %v276_v8  ;;  %v1520_v14 = vpack.c.bf16 %v1371_v11, %v1369_v10  ;;  %v1368_v15 = vld [vmem:[%s1940_s5 + $0x90] sm:$0xff]  ;;  %v1374_v23 = vld [vmem:[%s1940_s5 + $0xc0] sm:$0xff]  ;;  %v1379_v25 = vld [vmem:[%s1940_s5 + $0xe8] sm:$0xff] }
  0x12   : > { %1442 = vmatmul.mubr.msk.f32.vlgmr.msra.gmra.mrb[0].mxu0 %vm278_vm2, %v277_v7  ;;  %1444 = vmatprep.subr.mxu0 %v1599_v0  ;;  %v1372_v22 = vld [vmem:[%s1940_s5 + $0xb0] sm:$0xff]  ;;  %v1381_v30 = vld [vmem:[%s1940_s5 + $0xf8] sm:$0xff]  ;;  %v1383_v31 = vld [vmem:[%s1940_s5 + $0x108] sm:$0xff] }
  0x13   : > { %1445 = vmatpush3.msk.msra.mxu0 %vm282_vm1, %v276_v8  ;;  %1446 = vmatprep.mubr.msk.f32.mxu0 %vm1600_vm0, %v1599_v0  ;;  %v1526_v26 = vpack.c.bf16 %v1374_v23, %v1372_v22  ;;  %v1376_v28 = vld [vmem:[%s1940_s5 + $0xd0] sm:$0xff]  ;;  %v1385_v39 = vld [vmem:[%s1940_s5 + $0x118] sm:$0xff]  ;;  %v1395_v46 = vld [vmem:[%s1940_s5 + $0x148] sm:$0xff] }
  0x14   : > { %1502 = vmatprep.subr.bf16.mxu0 %v1601_v3  ;;  %1590 = vset.pattern.permute.xlu0 %v1602_v29  ;;  %v1378_v29 = vld [vmem:[%s1940_s5 + $0xe0] sm:$0xff]  ;;  %v1384_v40 = vld [vmem:[%s1940_s5 + $0x110] sm:$0xff]  ;;  %v1393_v42 = vld [vmem:[%s1940_s5 + $0x138] sm:$0xff] }
  0x15   : > { %v1392_v45 = vld [vmem:[%s1940_s5 + $0x130] sm:$0xff]  ;;  %v1394_v51 = vld [vmem:[%s1940_s5 + $0x140] sm:$0xff]  ;;  %v1399_v54 = vld [vmem:[%s1940_s5 + $0x168] sm:$0xff] }
  0x16   : > { %1447 = vmatmul.mubr.msk.f32.vlgmr.msra.gmra.mrb[2].mxu0 %vm278_vm2, %v1348_v12  ;;  %v1396_v52 = vld [vmem:[%s1940_s5 + $0x150] sm:$0xff]  ;;  %v1401_v55 = vld [vmem:[%s1940_s5 + $0x178] sm:$0xff]  ;;  %vm1281_vm9 = vmor %vm1280_vm8, %vm1279_vm7 }
  0x17   : > { %1504 = vmatpush3.bf16.msra.mxu0 %v1503_v13  ;;  %1457 = vmatprep.mubr.msk.f32.mxu0 %vm1600_vm0, %v1599_v0  ;;  %v761_v13 = vld [vmem:[%s1939_s4] sm:$0x7]  ;;  %v1560_v58 = vpack.c.bf16 %v1401_v55, %v1399_v54  ;;  %v1400_v60 = vld [vmem:[%s1940_s5 + $0x170] sm:$0xff] }
  0x18   : > { %1505 = vmatprep.subr.bf16.mxu0 %v1601_v3 }
  0x1b   : > { %1507 = vmatpush3.bf16.msra.mxu0 %v1506_v16  ;;  %v1370_v16 = vld [vmem:[%s1940_s5 + $0xa0] sm:$0xff] }
  0x1c   : > { %1471 = vmatprep.subr.mxu0 %v1599_v0 }
  0x8a   : > { %v745_v63 = vpop.permute.xlu0 %744 }
  0x8f   : > { %v753_v6 = vpop.permute.xlu0 %752 }
  0xe5   : > { %v352_v17 = vpop.f32.mrb[0].mxu0 }
  0xe6   : > { %v1443_v18 = vpop.f32.mrb[1].mxu0  ;;  %1469 = vmatmul.mubr.msk.f32.vlgmr.msra.gmra.mrb[0].mxu1 %vm440_vm3, %v352_v17  ;;  %v1373_v17 = vld [vmem:[%s1940_s5 + $0xb8] sm:$0xff] }
  0xe7   : > { %1484 = vmatprep.mubr.msk.f32.mxu1 %vm1600_vm0, %v1599_v0  ;;  %1516 = vmatpush3.bf16.msra.mxu1 %v1515_v24  ;;  %v1375_v18 = vld [vmem:[%s1940_s5 + $0xc8] sm:$0xff]  ;;  %v1377_v24 = vld [vmem:[%s1940_s5 + $0xd8] sm:$0xff] }
  0xe8   : > { %1517 = vmatprep.subr.bf16.mxu1 %v1601_v3 }
  0xe9   : > { %v431_v19 = vpop.f32.mrb[2].mxu0 }
  0xea   : > { %v1448_v20 = vpop.f32.mrb[3].mxu0  ;;  %1458 = vmatmul.mubr.msk.f32.vlgmr.msra.gmra.mrb[4].mxu0 %vm440_vm3, %v431_v19  ;;  %v1366_v19 = vld [vmem:[%s1939_s4 + $0x4] sm:$0x7] }
  0xeb   : > { %1472 = vmatpush3.msk.msra.mxu0 %vm282_vm1, %v276_v8  ;;  %1473 = vmatprep.mubr.msk.f32.mxu0 %vm1600_vm0, %v1599_v0  ;;  %v758_v8 = vpop.permute.xlu1 %757  ;;  %v1522_v20 = vpack.c.bf16 %v1370_v16, %v1368_v15 }
  0xec   : > { %1487 = vmatprep.subr.mxu0 %v1599_v0  ;;  %1519 = vmatpush3.bf16.msra.mxu1 %v1518_v27  ;;  %v1528_v27 = vpack.c.bf16 %v1379_v25, %v1377_v24 }
  0xed   : > { %1537 = vmatprep.subr.bf16.mxu1 %v1536_v41  ;;  %v1391_v41 = vld [vmem:[%s1940_s5 + $0x128] sm:$0xff] }
  0xee   : > { %1474 = vmatmul.mubr.msk.f32.vlgmr.msra.gmra.mrb[6].mxu0 %vm278_vm2, %v1357_v21  ;;  %v1524_v21 = vpack.c.bf16 %v1375_v18, %v1373_v17  ;;  %v1552_v43 = vpack.c.bf16 %v1393_v42, %v1391_v41 }
  0xef   : > { %1489 = vmatprep.mubr.msk.f32.mxu0 %vm1600_vm0, %v1599_v0 }
 0x1b9   : > { %v583_v32 = vpop.f32.mrb[0].mxu1 }
 0x1ba   : > { %v1470_v33 = vpop.f32.mrb[1].mxu1 }
 0x1bb   : > { %v1532_v33 = vpack.c.bf16 %v1383_v31, %v1381_v30 }
 0x1bd   : > { %v510_v34 = vpop.f32.mrb[4].mxu0 }
 0x1be   : > { %v584_v35 = vadd.f32 %v583_v32, %v510_v34  ;;  %v1459_v36 = vpop.f32.mrb[5].mxu0  ;;  %v1530_v32 = vpack.c.bf16 %v1378_v29, %v1376_v28  ;;  %v1380_v34 = vld [vmem:[%s1940_s5 + $0xf0] sm:$0xff] }
 0x1c1   : > { %v658_v37 = vpop.f32.mrb[6].mxu0 }
 0x1c2   : > { %v1475_v38 = vpop.f32.mrb[7].mxu0  ;;  %1485 = vmatmul.mubr.msk.f32.vlgmr.msra.gmra.mrb[2].mxu1 %vm440_vm3, %v658_v37  ;;  %v853_v37 = vld [vmem:[%s1940_s5 + $0x88] sm:$0xff] }
 0x1c3   : > { %1090 = vmatprep.mubr.f32.mxu1 %v1599_v0  ;;  %1539 = vmatpush1.bf16.msra.mxu1 %v1538_v44  ;;  %v852_v38 = vld [vmem:[%s1940_s5 + $0x80] sm:$0xff] }
 0x1c4   : > { %1541 = vmatprep.subr.bf16.mxu1 %v1540_v47  ;;  %v1390_v44 = vld [vmem:[%s1940_s5 + $0x120] sm:$0xff]  ;;  %v1397_v47 = vld [vmem:[%s1940_s5 + $0x158] sm:$0xff] }
 0x1c5   : > { %v1554_v48 = vpack.c.bf16 %v1392_v45, %v1390_v44  ;;  %v1556_v49 = vpack.c.bf16 %v1397_v47, %v1395_v46 }
 0x1c7   : > { %1543 = vmatpush1.bf16.msra.mxu1 %v1542_v50 }
 0x1c8   : > { %1545 = vmatprep.subr.bf16.mxu1 %v1544_v53 }
 0x1cb   : > { %1547 = vmatpush1.bf16.msra.mxu1 %v1546_v56  ;;  %v1558_v56 = vpack.c.bf16 %v1396_v52, %v1394_v51 }
 0x1cc   : > { %1549 = vmatprep.subr.bf16.mxu1 %v1548_v59  ;;  %v1398_v59 = vld [vmem:[%s1940_s5 + $0x160] sm:$0xff] }
 0x1cf   : > { %1551 = vmatpush1.bf16.msra.mxu1 %v1550_v62  ;;  %v1403_v62 = vld [vmem:[%s1940_s5 + $0x188] sm:$0xff] }
 0x1d0   : > { %1042 = vmatprep.subr.mxu1 %v853_v37 }
 0x1d3   : > { %1043 = vmatpush1.msra.mxu1 %v852_v38 }
 0x1d4   : > { %1553 = vmatprep.subr.bf16.mxu1 %v1552_v43 }
 0x295   : > { %v736_v1 = vpop.f32.mrb[2].mxu1 }
 0x296   : > { %v740_v2 = vadd.f32 %v736_v1, %v584_v35  ;;  %v1486_v3 = vpop.f32.mrb[3].mxu1  ;;  %v1382_v35 = vld [vmem:[%s1940_s5 + $0x100] sm:$0xff]  ;;  %v1388_v1 = vld [vmem:[%s1939_s4 + $0x8] sm:$0x7] }
 0x297   : > { %v1534_v36 = vpack.c.bf16 %v1382_v35, %v1380_v34 }
 0x298   : > { %v747_v4 = vadd.f32 %v745_v63, %v740_v2  ;;  %v1405_v63 = vld [vmem:[%s1940_s5 + $0x198] sm:$0xff]  ;;  %v1562_v2 = vpack.c.bf16 %v1400_v60, %v1398_v59 }
 0x299   : > { %v1564_v3 = vpack.c.bf16 %v1405_v63, %v1403_v62 }
 0x29a   : > { %v749_v5 = vmul.f32 0.1, %v747_v4  ;;  %vm748_vm4 = vcmp.gt.f32.partialorder %v747_v4, 0.0 }
 0x29c   : > { %v750_v7 = vsel %vm748_vm4, %v747_v4, %v749_v5  ;;  %v1402_v4 = vld [vmem:[%s1940_s5 + $0x180] sm:$0xff]  ;;  %v1404_v5 = vld [vmem:[%s1940_s5 + $0x190] sm:$0xff] }
 0x29d   : > { %v755_v9 = vmul.f32 %v753_v6, %v750_v7  ;;  %v1407_v6 = vld [vmem:[%s1940_s5 + $0x1a8] sm:$0xff]  ;;  %v1406_v7 = vld [vmem:[%s1940_s5 + $0x1a0] sm:$0xff] }
 0x29f   : > { %v1789_v12 = vadd.f32 %v758_v8, %v755_v9  ;;  %v1267_v8 = vld [vmem:[%s1941_s6] sm:$0x7] }
 0x2a0   : > { %1270 = vperm.xlu1 %1589, %v1267_v8  }
 0x2a1   : > { %1488 = vmatpush3.msra.mxu0 %v1789_v12 }
 0x2a2   : > { %1490 = vmatmul.mubr.msk.f32.vlgmr.msra.gmra.mrb[8].mxu0 %vm762_vm5, %v761_v13  ;;  %1492 = vmatprep.subr.mxu0 %v1599_v0 }
 0x2a3   : > { %1493 = vmatpush3.msra.mxu0 %v1789_v12  ;;  %1494 = vmatprep.mubr.msk.f32.mxu0 %vm1600_vm0, %v1599_v0 }
 0x2a4   : > { %1521 = vmatprep.subr.bf16.mxu0 %v1520_v14 }
 0x2a6   : > { %1495 = vmatmul.mubr.msk.f32.vlgmr.msra.gmra.mrb[10].mxu0 %vm762_vm5, %v1366_v19 }
 0x2a7   : > { %1523 = vmatpush1.bf16.msra.mxu0 %v1522_v20  ;;  %1016 = vmatprep.mubr.f32.mxu0 %v1599_v0 }
 0x2a8   : > { %1525 = vmatprep.subr.bf16.mxu0 %v1524_v21 }
 0x2ab   : > { %1527 = vmatpush1.bf16.msra.mxu0 %v1526_v26 }
 0x2ac   : > { %1529 = vmatprep.subr.bf16.mxu0 %v1528_v27 }
 0x2af   : > { %1531 = vmatpush1.bf16.msra.mxu0 %v1530_v32 }
 0x2b0   : > { %1533 = vmatprep.subr.bf16.mxu0 %v1532_v33 }
 0x2b3   : > { %1535 = vmatpush1.bf16.msra.mxu0 %v1534_v36 }
 0x2b4   : > { %968 = vmatprep.subr.mxu0 %v1385_v39 }
 0x2b7   : > { %969 = vmatpush1.msra.mxu0 %v1384_v40 }
 0x2b8   : > { %1497 = vmatprep.subr.mxu0 %v1599_v0 }
 0x31f   : > { %v1271_v14 = vpop.permute.xlu1 %1270 }
 0x375   : > { %v832_v50 = vpop.f32.mrb[8].mxu0 }
 0x376   : > { %v1491_v53 = vpop.f32.mrb[9].mxu0  ;;  %1387 = vmatmul.mubr.msk.f32.vlgmr.msra.gmra.mrb[4].mxu1 %vm948_vm6, %v832_v50 }
 0x377   : > { %1555 = vmatpush1.bf16.msra.mxu1 %v1554_v48  ;;  %1258 = vmatprep.mubr.f32.mxu1 %v1599_v0 }
 0x378   : > { %1557 = vmatprep.subr.bf16.mxu1 %v1556_v49 }
 0x379   : > { %v925_v57 = vpop.f32.mrb[10].mxu0 }
 0x37a   : > { %1386 = vmatmul.mubr.msk.f32.vlgmr.msra.gmra.mrb[12].mxu0 %vm948_vm6, %v925_v57  ;;  %v1496_v61 = vpop.f32.mrb[11].mxu0 }
 0x37b   : > { %1498 = vmatpush3.msra.mxu0 %v1789_v12  ;;  %1499 = vmatprep.mubr.msk.f32.mxu0 %vm1600_vm0, %v1599_v0  ;;  %v1566_v0 = vpack.c.bf16 %v1404_v5, %v1402_v4 }
 0x37c   : > { %1559 = vmatpush1.bf16.msra.mxu1 %v1558_v56 }
 0x37d   : > { %1561 = vmatprep.subr.bf16.mxu1 %v1560_v58 }
 0x37e   : > { %1500 = vmatmul.mubr.msk.f32.vlgmr.msra.gmra.mrb[14].mxu0 %vm762_vm5, %v1388_v1 }
 0x380   : > { %1563 = vmatpush1.bf16.msra.mxu1 %v1562_v2 }
 0x381   : > { %1565 = vmatprep.subr.bf16.mxu1 %v1564_v3 }
 0x384   : > { %1567 = vmatpush1.bf16.msra.mxu1 %v1566_v0 }
 0x385   : > { %1210 = vmatprep.subr.mxu1 %v1407_v6 }
 0x388   : > { %1211 = vmatpush1.msra.mxu1 %v1406_v7 }
 0x44d   : > { %v1018_v9 = vpop.f32.mrb[12].mxu0 }
 0x44e   : > { %v1020_v10 = vpop.f32.mrb[13].mxu0 }
 0x451   : > { %v1168_v11 = vpop.f32.mrb[14].mxu0 }
 0x452   : > { %1408 = vmatmul.mubr.msk.f32.vlgmr.msra.gmra.mrb[4].mxu1 %vm948_vm6, %v1168_v11  ;;  %v1501_v12 = vpop.f32.mrb[15].mxu0 }
 0x525   : > { %v1260_v13 = vpop.f32.mrb[4].mxu1 }
 0x526   : > { %v1568_v15 = vadd.f32 %v1260_v13, %v1018_v9  ;;  %v1262_v16 = vpop.f32.mrb[5].mxu1 }
 0x527   : > { %v1569_v17 = vadd.f32 %v1262_v16, %v1020_v10 }
 0x528   : > { %v1273_v18 = vadd.f32 %v1568_v15, %v1271_v14 }
 0x529   : > { %v1274_v19 = vadd.f32 %v1569_v17, %v1271_v14 }
 0x52b   : > { %v1277_v20 = vcombine.low %v1273_v18, %v1274_v19 }
 0x52d   : > { %1282 = vst.msk [vmem:[%s275_s11] sm:$0x77] %vm1281_vm9, %v1277_v20 }
 0x52e PF: > { %s17_s24 = sadd.s32 1, %s1597_s24  }
 0x52f   : > { %p14_p4 = scmp.ge.s32.totalorder %s17_s24, 4  }
 0x531   :  { %16 = sbr.rel (!%p14_p4) target bundleno = 1 (0x1), region = 86 }

</bundles_post_ra>
